<compile_context>
chip_gen: v5e
topology: v5e:2x2
jax: 0.10.0
libtpu: 0.0.40
codegen_flags: <defaults>
</compile_context>

<pallas_src>
import math

import jax
import jax.numpy as jnp
from jax.experimental import pallas as pl
from jax.experimental.pallas import tpu as pltpu


def _round_up(v: int, m: int) -> int:
    return ((v + m - 1) // m) * m


def _vmem_capacity_bytes() -> int:
    try:
        return int(pltpu.get_tpu_info().vmem_capacity_bytes)
    except Exception:
        return 64 << 20  # conservative default: v7x per-TensorCore VMEM


def _max_identity(dtype):
    if jnp.issubdtype(dtype, jnp.floating):
        return float("-inf")
    if jnp.issubdtype(dtype, jnp.integer):
        return int(jnp.iinfo(dtype).min)
    raise TypeError(f"unsupported dtype for global max pool: {dtype}")


def _direct_max_kernel(x_ref, o_ref):
    # Whole spatial extent resident in this block: one reduce, one store.
    o_ref[...] = jnp.max(x_ref[...], axis=-1, keepdims=True)


def _make_running_max_kernel(l_total: int, tl: int, fill, need_mask: bool):
    # Spatial axis tiled: running max accumulated in the resident output
    # block across the last ("arbitrary") grid axis.
    def kernel(x_ref, o_ref):
        k = pl.program_id(1)

        @pl.when(k == 0)
        def _init():
            o_ref[...] = jnp.full(o_ref.shape, fill, dtype=o_ref.dtype)

        blk = x_ref[...]
        if need_mask:
            # Ragged tail tile along L: out-of-range lanes -> max identity.
            col = jax.lax.broadcasted_iota(jnp.int32, blk.shape, 1)
            blk = jnp.where(col + k * tl < l_total, blk,
                            jnp.asarray(fill, dtype=blk.dtype))
        o_ref[...] = jnp.maximum(o_ref[...],
                                 jnp.max(blk, axis=-1, keepdims=True))

    return kernel


def fast_global_max_pool_2d(x: jax.Array, *,
                            target_block_bytes: int | None = None) -> jax.Array:
    """y[n, c] = max over all spatial positions of x[n, c, ...]."""
    if x.ndim < 3:
        raise ValueError("expected at least (N, C, spatial...) input")
    N, C = x.shape[0], x.shape[1]
    M = N * C
    L = math.prod(x.shape[2:])  # host-side static product
    if L == 0:
        raise ValueError("global max pool over an empty spatial extent")

    x2d = x.reshape(M, L)
    itemsize = x.dtype.itemsize
    # Packed sublane count: f32 -> 8, bf16/f16 -> 16, int8/fp8 -> 32.
    sub = {4: 8, 2: 16, 1: 32}.get(itemsize, 8)

    # Generation-aware block budget (VMEM-padded footprint of one block).
    vmem_cap = _vmem_capacity_bytes()
    if target_block_bytes is None:
        target_block_bytes = max(4 << 20, min(16 << 20, vmem_cap // 4))

    lane_padded_row = _round_up(L, 128) * itemsize  # VMEM bytes per block row

    tile_spatial = sub * lane_padded_row > target_block_bytes
    if tile_spatial:
        # Huge spatial maps: tile L (last grid axis, multiple of 128) so the
        # block footprint stays bounded (worst on v7x's 64 MiB VMEM) and the
        # pipeline stays uniform.
        tm = sub
        tl = max(128, (target_block_bytes // (sub * itemsize)) // 128 * 128)
    else:
        # Common case: full spatial extent per block. The reduced block dim
        # equals the full array dim, so no lane-padding correction is needed
        # and the (8,128) rule is satisfied for any L.
        tm = max(sub, (target_block_bytes // lane_padded_row) // sub * sub)
        tm = min(tm, _round_up(M, sub))
        tl = L

    # Guarantee >= 2 steps on the "parallel" row axis when possible so both
    # of v7x's TensorCores get work (costs only one extra ~0.35 us grid step
    # on single-TC v5e/v6e).
    if M >= 2 * sub and pl.cdiv(M, tm) < 2:
        tm = _round_up(pl.cdiv(M, 2), sub)

    num_row_blocks = pl.cdiv(M, tm)
    num_l_blocks = pl.cdiv(L, tl)
    need_mask = tile_spatial and (L % tl != 0)
    grid = (num_row_blocks, num_l_blocks)

    if num_l_blocks == 1 and not need_mask:
        kernel = _direct_max_kernel
    else:
        kernel = _make_running_max_kernel(L, tl, _max_identity(x.dtype), need_mask)

    # VMEM budget: double-buffered input block + tiny output + headroom,
    # capped well under the chip's physical VMEM (v7x: 64 MiB -> <= 48 MiB).
    block_vmem = tm * _round_up(tl, 128) * itemsize
    vmem_limit = int(min(vmem_cap * 3 // 4,
                         max(32 << 20, 2 * block_vmem + (8 << 20))))

    cost = pl.CostEstimate(
        flops=M * L,
        transcendentals=0,
        bytes_accessed=M * L * itemsize + M * itemsize,
    )

    out2d = pl.pallas_call(
        kernel,
        out_shape=jax.ShapeDtypeStruct((M, 1), x.dtype),
        grid=grid,
        in_specs=[pl.BlockSpec((tm, tl), lambda i, k: (i, k))],
        out_specs=pl.BlockSpec((tm, 1), lambda i, k: (i, 0)),
        compiler_params=pltpu.CompilerParams(
            dimension_semantics=("parallel", "arbitrary"),
            vmem_limit_bytes=vmem_limit,
        ),
        cost_estimate=cost,
    )(x2d)

    # TODO(synk): for small spatial extents (L < 128, e.g. 7x7 backbone
    # outputs) a channels-on-lanes layout would keep lanes/DMA dense; the
    # (M, L) row layout leaves lanes only L/128 utilized in that regime.
    return out2d.reshape(N, C)


if __name__ == "__main__":
    key = jax.random.PRNGKey(0)
    k1, k2, k3 = jax.random.split(key, 3)

    # Primary check: small NCHW input consistent with FastGlobalMaxPool2d.
    x = jax.random.normal(k1, (2, 4, 16, 16), dtype=jnp.float32)
    y = fast_global_max_pool_2d(x)
    jax.block_until_ready(y)
    y_ref = jnp.max(x.reshape(x.shape[0], x.shape[1], -1), axis=2)
    assert y.shape == (2, 4)
    assert y.dtype == x.dtype
    assert jnp.array_equal(y, y_ref)

    # Exercise the L-tiled running-max path (ragged last spatial tile) by
    # forcing a tiny block budget on a non-multiple-of-128 spatial extent.
    x2 = jax.random.normal(k2, (2, 4, 15, 15), dtype=jnp.float32)
    y2 = fast_global_max_pool_2d(x2, target_block_bytes=4096)
    jax.block_until_ready(y2)
    y2_ref = jnp.max(x2.reshape(2, 4, -1), axis=2)
    assert jnp.array_equal(y2, y2_ref)

    # Exercise >= 2 row blocks (megacore split) and bf16 sublane packing.
    x3 = jax.random.normal(k3, (4, 64, 8, 8), dtype=jnp.bfloat16)
    y3 = fast_global_max_pool_2d(x3)
    jax.block_until_ready(y3)
    y3_ref = jnp.max(x3.reshape(4, 64, -1), axis=2)
    assert y3.dtype == jnp.bfloat16
    assert jnp.array_equal(y3, y3_ref)

    print("KERNEL_OK")
</pallas_src>

<mosaic_0001>
module attributes {stable_mosaic.version = 11 : i64} {
  func.func @_direct_max_kernel(%arg0: i32, %arg1: i32, %arg2: memref<8x256xf32, #tpu.memory_space<vmem>>, %arg3: memref<8x1xf32, #tpu.memory_space<vmem>>) attributes {dimension_semantics = [#tpu.dimension_semantics<parallel>, #tpu.dimension_semantics<arbitrary>], iteration_bounds = array<i64: 1, 1>, scalar_prefetch = 0 : i64, scratch_operands = 0 : i64, tpu.core_type = #tpu.core_type<tc>, window_params = [{transform_indices = @transform_0, window_bounds = array<i64: 8, 256>}, {transform_indices = @transform_1, window_bounds = array<i64: 8, 1>}]} {
    %c0 = arith.constant 0 : index
    %c0_0 = arith.constant 0 : index
    %0 = vector.load %arg2[%c0, %c0_0] : memref<8x256xf32, #tpu.memory_space<vmem>>, vector<8x256xf32>
    %cst = arith.constant dense<0xFF800000> : vector<8xf32>
    %1 = vector.multi_reduction <maximumf>, %0, %cst [1] : vector<8x256xf32> to vector<8xf32>
    %2 = vector.shape_cast %1 : vector<8xf32> to vector<8x1xf32>
    %c0_1 = arith.constant 0 : index
    %c0_2 = arith.constant 0 : index
    %3 = vector.load %arg3[%c0_1, %c0_2] : memref<8x1xf32, #tpu.memory_space<vmem>>, vector<8x1xf32>
    tpu.vector_store %arg3[%c0_1, %c0_2], %2 {strides = array<i32>} : memref<8x1xf32, #tpu.memory_space<vmem>>, vector<8x1xf32>,
    return
  }
  func.func @transform_0(%arg0: i32, %arg1: i32) -> (i32, i32) {
    %c0_i32 = arith.constant 0 : i32
    return %arg0, %arg1 : i32, i32
  }
  func.func @transform_1(%arg0: i32, %arg1: i32) -> (i32, i32) {
    %c0_i32 = arith.constant 0 : i32
    %c0_i32_0 = arith.constant 0 : i32
    return %arg0, %c0_i32 : i32, i32
  }
}

</mosaic_0001>

<bundles_post_ra>
// kernel: tpu_custom_call.1
= control target key start
LH: loop header
LB: loop body
LE: loop exit
PB: predicated region body
PF: predicated region fallthrough
CT: control target
= control target key end

     0   :  { %6 = vsyncpa [#allocation3], 0  ;;  %s61_s9 = smov [#allocation2]   ;;  %s78_s0 = inlined_call_operand.hbm [shape: f32[8,256], index: 0, kind: input, shape index: {}]   ;;  %s79_s1 = inlined_call_operand.vmem [shape: f32[8,1], index: 1, kind: output, shape index: {}]  }
   0x1   :  { %s12_s8 = sshll.u32 %s78_s0, 4  ;;  %s14_s10 = sshll.u32 %s61_s9, 4  ;;  %s13_s8 = int_to_ptr.hbm [resolvable:$true] %s12_s8  ;;  %s15_s10 = int_to_ptr.vmem [resolvable:$true] %s14_s10 }
   0x2   :  { %17 = dma.hbm_to_vmem [thread:$0]  %s13_s8, 256, %s15_s10, [#allocation3]  }
   0x3   :  { %59 = dma.done.wait [#allocation3], 256  }
   0x4   :  { %60 = vsyncadd [#allocation3], 4294967040  ;;  %v22_v0 = vld [vmem:[#allocation2] sm:$0xff]  ;;  %v23_v1 = vld [vmem:[#allocation2 + $0x8] sm:$0xff]  ;;  %vm27_vm0 = vcmask 7168  }
   0x5   :  { %v24_v2 = vmax.f32 %v22_v0, %v23_v1 }
   0x7   :  { %25 = vmax.xlane.f32.xlu0 %v24_v2 }
  0x7a   :  { %v26_v3 = vpop.xlane.xlu0 %25 }
  0x7b   :  { %28 = vst.msk [vmem:[%s79_s1] sm:$0xff] %vm27_vm0, %v26_v3 }
  0x7c   :  { %33 = vsyncpa [#allocation3], 1 }

</bundles_post_ra>
